<compile_context>
chip_gen: v7x
topology: tpu7x:2x2x1
jax: 0.10.0
libtpu: 0.0.40
codegen_flags: <defaults>
</compile_context>

<pallas_src>
import jax
import jax.numpy as jnp
from jax.experimental import pallas as pl
from jax.experimental.pallas import tpu as pltpu


def _hidden(s_ref, a_ref, w1s_ref, w1a_ref, b1_ref, w2_ref, b2_ref):
    """Shared MLP trunk: ReLU(ReLU([s||a] @ W1 + b1) @ W2 + b2).

    Weight refs hold bf16; activations are cast to bf16 only at the MXU inputs
    (f32 accumulation). All elementwise math stays f32.
    """
    # Layer 1, split at the state/action boundary (no runtime concat).
    h = jnp.dot(s_ref[...].astype(jnp.bfloat16), w1s_ref[...],
                preferred_element_type=jnp.float32)
    # One-hot values are exactly representable in bf16.
    # TODO(synk): replace this tiny (B,A)x(A,H) MXU pass with a VPU 4-way
    # select (sum_k a[:, k:k+1] * w1a[k]) to shorten the serial MXU chain.
    h = h + jnp.dot(a_ref[...].astype(jnp.bfloat16), w1a_ref[...],
                    preferred_element_type=jnp.float32)
    h = jnp.maximum(h + b1_ref[...], 0.0)
    # Layer 2
    h = jnp.dot(h.astype(jnp.bfloat16), w2_ref[...],
                preferred_element_type=jnp.float32) + b2_ref[...]
    return jnp.maximum(h, 0.0)


def _dynamics_kernel_small(s_ref, a_ref, w1s_ref, w1a_ref, b1_ref, w2_ref,
                           b2_ref, wh_ref, bh_ref, out_ref):
    """Tiny-batch path: fused lane-dense (B, 128) head slab output."""
    h = _hidden(s_ref, a_ref, w1s_ref, w1a_ref, b1_ref, w2_ref, b2_ref)
    out_ref[...] = (
        jnp.dot(h.astype(jnp.bfloat16), wh_ref[...],
                preferred_element_type=jnp.float32) + bh_ref[...]
    )


def _dynamics_kernel_tiled(s_ref, a_ref, w1s_ref, w1a_ref, b1_ref, w2_ref,
                           b2_ref, wds_ref, bds_ref, wr_ref, br_ref,
                           ds_ref, r_ref):
    """Gridded large-batch path: un-padded ds / r outputs (no write amp)."""
    h = _hidden(s_ref, a_ref, w1s_ref, w1a_ref, b1_ref, w2_ref, b2_ref)
    hb = h.astype(jnp.bfloat16)
    ds_ref[...] = (
        jnp.dot(hb, wds_ref[...], preferred_element_type=jnp.float32)
        + bds_ref[...]
    )
    r_ref[...] = (
        jnp.dot(hb, wr_ref[...], preferred_element_type=jnp.float32)
        + br_ref[...]
    )


def dynamics_model_forward(s, a_onehot, packed, *, tile_b=1024):
    """Pallas implementation of DynamicsModel.forward.

    packed = dict from pack_params. Returns (ds, r) with ds:(B, S), r:(B,).

    tile_b: batch tile for the gridded path. 1024 amortizes per-step grid
    overhead; it is a multiple of 256 (fills v6e/v7x MXU height) and of 128
    (v5e). The double-buffered working set at tile_b=1024 is ~4 MiB, so no
    vmem_limit_bytes override is needed on any generation.
    """
    B, S = s.shape
    A = a_onehot.shape[1]
    H = packed["w2"].shape[0]

    if B < tile_b:
        # Tiny batch: single ungridded call, every operand a full-array VMEM
        # block; fused 128-lane head slab for unmasked lane-dense stores.
        head_pad = packed["wh"].shape[1]
        vmem = pl.BlockSpec(memory_space=pltpu.MemorySpace.VMEM)
        out = pl.pallas_call(
            _dynamics_kernel_small,
            out_shape=jax.ShapeDtypeStruct((B, head_pad), jnp.float32),
            in_specs=[vmem] * 9,
            out_specs=vmem,
        )(s, a_onehot, packed["w1s"], packed["w1a"], packed["b1"],
          packed["w2"], packed["b2"], packed["wh"], packed["bh"])
        ds = out[:, :S]
        r = out[:, S]
        return ds, r

    # Large batch: grid over batch rows (partial edge block handled by Pallas,
    # no wrapper-side padding); weights/biases stay resident (index map (0,0));
    # batch axis marked "parallel" so the two v7x TensorCores split the grid.
    rep = lambda i: (0, 0)
    row = lambda i: (i, 0)
    ds, r2 = pl.pallas_call(
        _dynamics_kernel_tiled,
        out_shape=(jax.ShapeDtypeStruct((B, S), jnp.float32),
                   jax.ShapeDtypeStruct((B, 1), jnp.float32)),
        grid=(pl.cdiv(B, tile_b),),
        in_specs=[
            pl.BlockSpec((tile_b, S), row),
            pl.BlockSpec((tile_b, A), row),
            pl.BlockSpec((S, H), rep),
            pl.BlockSpec((A, H), rep),
            pl.BlockSpec((1, H), rep),
            pl.BlockSpec((H, H), rep),
            pl.BlockSpec((1, H), rep),
            pl.BlockSpec((H, S), rep),
            pl.BlockSpec((1, S), rep),
            pl.BlockSpec((H, 1), rep),
            pl.BlockSpec((1, 1), rep),
        ],
        out_specs=(pl.BlockSpec((tile_b, S), row),
                   pl.BlockSpec((tile_b, 1), row)),
        compiler_params=pltpu.CompilerParams(
            dimension_semantics=("parallel",)),
    )(s, a_onehot, packed["w1s"], packed["w1a"], packed["b1"],
      packed["w2"], packed["b2"], packed["wds"], packed["bds"],
      packed["wr"], packed["br"])
    return ds, r2[:, 0]


def init_params(key, state_dim, action_dim, hidden_dim):
    """Deterministic init mirroring nn.Linear's U(-1/sqrt(fan_in), 1/sqrt(fan_in)).

    Weights stored transposed relative to PyTorch, i.e. (in, out), in f32.
    """
    def linear(key, fan_in, fan_out):
        kw, kb = jax.random.split(key)
        bound = 1.0 / jnp.sqrt(float(fan_in))
        w = jax.random.uniform(kw, (fan_in, fan_out), jnp.float32, -bound, bound)
        b = jax.random.uniform(kb, (1, fan_out), jnp.float32, -bound, bound)
        return w, b

    k1, k2, k3, k4 = jax.random.split(key, 4)
    w1, b1 = linear(k1, state_dim + action_dim, hidden_dim)
    w2, b2 = linear(k2, hidden_dim, hidden_dim)
    wds, bds = linear(k3, hidden_dim, state_dim)
    wr, br = linear(k4, hidden_dim, 1)
    return (w1, b1, w2, b2, wds, bds, wr, br)


def pack_params(params, state_dim):
    """Repack plain f32 params for the fused kernels.

    - w1 is split at the state/action boundary (removes the runtime concat).
    - bf16 weights (f32 biases, f32 MXU accumulation).
    - Small-batch path: head weights fused + zero-padded to 128 lanes (wh/bh).
    - Gridded path: separate un-padded heads (wds/bds, wr/br).
    """
    (w1, b1, w2, b2, wds, bds, wr, br) = params
    w1s, w1a = w1[:state_dim], w1[state_dim:]
    head = wds.shape[1] + 1
    head_pad = ((head + 127) // 128) * 128
    wh = jnp.pad(jnp.concatenate([wds, wr], axis=1),
                 ((0, 0), (0, head_pad - head)))
    bh = jnp.pad(jnp.concatenate([bds, br], axis=1),
                 ((0, 0), (0, head_pad - head)))
    bf = lambda w: w.astype(jnp.bfloat16)
    return dict(
        w1s=bf(w1s), w1a=bf(w1a), b1=b1,
        w2=bf(w2), b2=b2,
        wh=bf(wh), bh=bh,
        wds=bf(wds), bds=bds, wr=bf(wr), br=br,
    )


def _reference_forward(s, a_onehot, params):
    (w1, b1, w2, b2, wds, bds, wr, br) = params
    x = jnp.concatenate([s, a_onehot], axis=-1)
    h = jnp.maximum(x @ w1 + b1, 0.0)
    h = jnp.maximum(h @ w2 + b2, 0.0)
    return h @ wds + bds, (h @ wr + br)[:, 0]


if __name__ == "__main__":
    B, state_dim, action_dim, hidden_dim = 8, 16, 4, 32

    key = jax.random.PRNGKey(0)
    kp, ks, ka, ks2, ka2 = jax.random.split(key, 5)

    raw_params = init_params(kp, state_dim, action_dim, hidden_dim)
    packed = pack_params(raw_params, state_dim)

    # bf16 weights / dot inputs (f32 accumulate) -> loosened tolerances.
    TOL = dict(atol=2e-2, rtol=2e-2)

    # --- small-batch (ungridded) path, matches the PyTorch module's usage ---
    s = jax.random.normal(ks, (B, state_dim), jnp.float32)
    a_idx = jax.random.randint(ka, (B,), 0, action_dim)
    a_onehot = jax.nn.one_hot(a_idx, action_dim, dtype=jnp.float32)

    ds, r = dynamics_model_forward(s, a_onehot, packed)
    jax.block_until_ready((ds, r))

    ds_ref, r_ref = _reference_forward(s, a_onehot, raw_params)
    assert ds.shape == (B, state_dim) and r.shape == (B,)
    assert jnp.allclose(ds, ds_ref, **TOL)
    assert jnp.allclose(r, r_ref, **TOL)

    # --- large-batch (gridded, weights-resident, partial edge block) path ---
    B2 = 300
    s2 = jax.random.normal(ks2, (B2, state_dim), jnp.float32)
    a_idx2 = jax.random.randint(ka2, (B2,), 0, action_dim)
    a2 = jax.nn.one_hot(a_idx2, action_dim, dtype=jnp.float32)

    # tile_b=128 exercises the grid + masked edge block (300 = 2*128 + 44).
    ds2, r2 = dynamics_model_forward(s2, a2, packed, tile_b=128)
    jax.block_until_ready((ds2, r2))

    ds2_ref, r2_ref = _reference_forward(s2, a2, raw_params)
    assert ds2.shape == (B2, state_dim) and r2.shape == (B2,)
    assert jnp.allclose(ds2, ds2_ref, **TOL)
    assert jnp.allclose(r2, r2_ref, **TOL)

    print("KERNEL_OK")
</pallas_src>

<mosaic_0001>
module attributes {stable_mosaic.version = 11 : i64} {
  func.func @_dynamics_kernel_small(%arg0: memref<8x16xf32, #tpu.memory_space<vmem>>, %arg1: memref<8x4xf32, #tpu.memory_space<vmem>>, %arg2: memref<16x32xbf16, #tpu.memory_space<vmem>>, %arg3: memref<4x32xbf16, #tpu.memory_space<vmem>>, %arg4: memref<1x32xf32, #tpu.memory_space<vmem>>, %arg5: memref<32x32xbf16, #tpu.memory_space<vmem>>, %arg6: memref<1x32xf32, #tpu.memory_space<vmem>>, %arg7: memref<32x128xbf16, #tpu.memory_space<vmem>>, %arg8: memref<1x128xf32, #tpu.memory_space<vmem>>, %arg9: memref<8x128xf32, #tpu.memory_space<vmem>>) attributes {dimension_semantics = [], scalar_prefetch = 0 : i64, scratch_operands = 0 : i64, tpu.core_type = #tpu.core_type<tc>} {
    %c0 = arith.constant 0 : index
    %c0_0 = arith.constant 0 : index
    %0 = vector.load %arg0[%c0, %c0_0] : memref<8x16xf32, #tpu.memory_space<vmem>>, vector<8x16xf32>
    %1 = arith.truncf %0 : vector<8x16xf32> to vector<8x16xbf16>
    %c0_1 = arith.constant 0 : index
    %c0_2 = arith.constant 0 : index
    %2 = vector.load %arg2[%c0_1, %c0_2] : memref<16x32xbf16, #tpu.memory_space<vmem>>, vector<16x32xbf16>
    %cst = arith.constant dense<0.000000e+00> : vector<8x32xf32>
    %3 = tpu.matmul %1, %2, %cst {dimension_numbers = #tpu.dot_dimension_numbers<[1], [0], [0], [1], [0, 0, 1, 1], [], []>} : vector<8x16xbf16>, vector<16x32xbf16>, vector<8x32xf32> -> vector<8x32xf32>
    %c0_3 = arith.constant 0 : index
    %c0_4 = arith.constant 0 : index
    %4 = vector.load %arg1[%c0_3, %c0_4] : memref<8x4xf32, #tpu.memory_space<vmem>>, vector<8x4xf32>
    %5 = arith.truncf %4 : vector<8x4xf32> to vector<8x4xbf16>
    %c0_5 = arith.constant 0 : index
    %c0_6 = arith.constant 0 : index
    %6 = vector.load %arg3[%c0_5, %c0_6] : memref<4x32xbf16, #tpu.memory_space<vmem>>, vector<4x32xbf16>
    %cst_7 = arith.constant dense<0.000000e+00> : vector<8x32xf32>
    %7 = tpu.matmul %5, %6, %cst_7 {dimension_numbers = #tpu.dot_dimension_numbers<[1], [0], [0], [1], [0, 0, 1, 1], [], []>} : vector<8x4xbf16>, vector<4x32xbf16>, vector<8x32xf32> -> vector<8x32xf32>
    %8 = arith.addf %3, %7 : vector<8x32xf32>
    %c0_8 = arith.constant 0 : index
    %c0_9 = arith.constant 0 : index
    %9 = vector.load %arg4[%c0_8, %c0_9] : memref<1x32xf32, #tpu.memory_space<vmem>>, vector<1x32xf32>
    %10 = vector.broadcast %9 : vector<1x32xf32> to vector<8x32xf32>
    %11 = arith.addf %8, %10 : vector<8x32xf32>
    %cst_10 = arith.constant 0.000000e+00 : f32
    %12 = vector.broadcast %cst_10 : f32 to vector<8x32xf32>
    %13 = arith.maximumf %11, %12 : vector<8x32xf32>
    %14 = arith.truncf %13 : vector<8x32xf32> to vector<8x32xbf16>
    %c0_11 = arith.constant 0 : index
    %c0_12 = arith.constant 0 : index
    %15 = vector.load %arg5[%c0_11, %c0_12] : memref<32x32xbf16, #tpu.memory_space<vmem>>, vector<32x32xbf16>
    %cst_13 = arith.constant dense<0.000000e+00> : vector<8x32xf32>
    %16 = tpu.matmul %14, %15, %cst_13 {dimension_numbers = #tpu.dot_dimension_numbers<[1], [0], [0], [1], [0, 0, 1, 1], [], []>} : vector<8x32xbf16>, vector<32x32xbf16>, vector<8x32xf32> -> vector<8x32xf32>
    %c0_14 = arith.constant 0 : index
    %c0_15 = arith.constant 0 : index
    %17 = vector.load %arg6[%c0_14, %c0_15] : memref<1x32xf32, #tpu.memory_space<vmem>>, vector<1x32xf32>
    %18 = vector.broadcast %17 : vector<1x32xf32> to vector<8x32xf32>
    %19 = arith.addf %16, %18 : vector<8x32xf32>
    %cst_16 = arith.constant 0.000000e+00 : f32
    %20 = vector.broadcast %cst_16 : f32 to vector<8x32xf32>
    %21 = arith.maximumf %19, %20 : vector<8x32xf32>
    %22 = arith.truncf %21 : vector<8x32xf32> to vector<8x32xbf16>
    %c0_17 = arith.constant 0 : index
    %c0_18 = arith.constant 0 : index
    %23 = vector.load %arg7[%c0_17, %c0_18] : memref<32x128xbf16, #tpu.memory_space<vmem>>, vector<32x128xbf16>
    %cst_19 = arith.constant dense<0.000000e+00> : vector<8x128xf32>
    %24 = tpu.matmul %22, %23, %cst_19 {dimension_numbers = #tpu.dot_dimension_numbers<[1], [0], [0], [1], [0, 0, 1, 1], [], []>} : vector<8x32xbf16>, vector<32x128xbf16>, vector<8x128xf32> -> vector<8x128xf32>
    %c0_20 = arith.constant 0 : index
    %c0_21 = arith.constant 0 : index
    %25 = vector.load %arg8[%c0_20, %c0_21] : memref<1x128xf32, #tpu.memory_space<vmem>>, vector<1x128xf32>
    %26 = vector.broadcast %25 : vector<1x128xf32> to vector<8x128xf32>
    %27 = arith.addf %24, %26 : vector<8x128xf32>
    %c0_22 = arith.constant 0 : index
    %c0_23 = arith.constant 0 : index
    %28 = vector.load %arg9[%c0_22, %c0_23] : memref<8x128xf32, #tpu.memory_space<vmem>>, vector<8x128xf32>
    tpu.vector_store %arg9[%c0_22, %c0_23], %27 {strides = array<i32>} : memref<8x128xf32, #tpu.memory_space<vmem>>, vector<8x128xf32>,
    return
  }
}

</mosaic_0001>

<bundles_post_ra>
// kernel: tpu_custom_call.1
= control target key start
LH: loop header
LB: loop body
LE: loop exit
PB: predicated region body
PF: predicated region fallthrough
CT: control target
= control target key end

     0   :  { %14 = vsyncpa [#allocation3], 0  ;;  %s677_s0 = inlined_call_operand.hbm [shape: f32[8,16], index: 0, kind: input, shape index: {}]   ;;  %s678_s1 = inlined_call_operand.vmem [shape: f32[8,4], index: 1, kind: input, shape index: {}]   ;;  %s679_s2 = inlined_call_operand.hbm [shape: bf16[16,32], index: 2, kind: input, shape index: {}]   ;;  %s680_s3 = inlined_call_operand.vmem [shape: bf16[4,32], index: 3, kind: input, shape index: {}]   ;;  %s681_s4 = inlined_call_operand.hbm [shape: f32[1,32], index: 4, kind: input, shape index: {}]   ;;  %s682_s5 = inlined_call_operand.vmem [shape: bf16[32,32], index: 5, kind: input, shape index: {}]   ;;  %s683_s6 = inlined_call_operand.hbm [shape: f32[1,32], index: 6, kind: input, shape index: {}]   ;;  %s684_s7 = inlined_call_operand.vmem [shape: bf16[32,128], index: 7, kind: input, shape index: {}]   ;;  %s685_s8 = inlined_call_operand.vmem [shape: f32[1,128], index: 8, kind: input, shape index: {}]   ;;  %s686_s9 = inlined_call_operand.hbm [shape: f32[8,128], index: 9, kind: output, shape index: {}]  }
   0x1   :  { %15 = vsyncpa [#allocation6], 0 }
   0x2   :  { %16 = vsyncpa [#allocation9], 0 }
   0x3   :  { %17 = vsyncpa [#allocation4], 0  ;;  %s533_s30 = smov [#allocation5]   ;;  %s415_s13 = scalar_lea.hbm %s679_s2, 128 }
   0x4   :  { %s35_s10 = sshll.u32 %s533_s30, 4  ;;  %p416_p0 = scmp.ne.s32.totalorder %s679_s2, %s415_s13  ;;  %s36_s10 = int_to_ptr.vmem [resolvable:$true] %s35_s10 }
   0x5   :  { %p419_p1 = scmp.lt.u32.totalorder %s415_s13, %s679_s2 }
   0x7   :  { %p421_p2 = pnand %p419_p1, %p416_p0 }
   0x9   :  { %424 = shalt.err (!%p421_p2)
}
   0xa   :  { %s425_s18 = scalar_lea.vmem %s36_s10, 128  ;;  %p430_p4 = scmp.lt.s32.totalorder %s36_s10, %s36_s10 }
   0xb   :  { %p426_p3 = scmp.ne.s32.totalorder %s36_s10, %s425_s18  ;;  %p431_p5 = scmp.lt.s32.totalorder %s425_s18, %s425_s18 }
   0xd   :  { %p432_p6 = por %p431_p5, %p430_p4 }
   0xf   :  { %p433_p7 = pnand %p432_p6, %p426_p3 }
  0x11   :  { %436 = shalt.err (!%p433_p7)
}
  0x12   :  { %s534_s19 = smov 64   ;;  %s535_s20 = smov 4  }
  0x13   :  { %41 = dma.hbm_to_vmem [thread:$0]  %s679_s2, 128, %s36_s10, [#allocation6], %s534_s19, %s534_s19, %s535_s20  }
  0x14   :  { %s536_s23 = smov [#allocation2]   ;;  %s537_s25 = smov [#allocation7]  }
  0x15   :  { %s24_s24 = sshll.u32 %s536_s23, 4  ;;  %s50_s26 = sshll.u32 %s537_s25, 4  ;;  %s25_s24 = int_to_ptr.vmem [resolvable:$true] %s24_s24  ;;  %s51_s26 = int_to_ptr.vmem [resolvable:$true] %s50_s26 }
  0x16   :  { %s437_s29 = scalar_lea.hbm %s677_s0, 128 }
  0x17   :  { %p438_p8 = scmp.ne.s32.totalorder %s677_s0, %s437_s29  ;;  %p441_p9 = scmp.lt.u32.totalorder %s437_s29, %s677_s0 }
  0x19   :  { %p443_p10 = pnand %p441_p9, %p438_p8 }
  0x1b   :  { %446 = shalt.err (!%p443_p10)
}
  0x1c   :  { %s447_s2 = scalar_lea.vmem %s25_s24, 128  ;;  %p452_p12 = scmp.lt.s32.totalorder %s25_s24, %s25_s24 }
  0x1d   :  { %p448_p11 = scmp.ne.s32.totalorder %s25_s24, %s447_s2  ;;  %p453_p13 = scmp.lt.s32.totalorder %s447_s2, %s447_s2 }
  0x1f   :  { %p454_p0 = por %p453_p13, %p452_p12 }
  0x21   :  { %p455_p1 = pnand %p454_p0, %p448_p11 }
  0x23   :  { %458 = shalt.err (!%p455_p1)
}
  0x24   :  { %27 = dma.hbm_to_vmem [thread:$0]  %s677_s0, 128, %s25_s24, [#allocation3]  }
  0x25   :  { %s459_s17 = scalar_lea.hbm %s681_s4, 16 }
  0x26   :  { %p460_p2 = scmp.ne.s32.totalorder %s681_s4, %s459_s17  ;;  %p463_p3 = scmp.lt.u32.totalorder %s459_s17, %s681_s4 }
  0x28   :  { %p465_p4 = pnand %p463_p3, %p460_p2 }
  0x2a   :  { %468 = shalt.err (!%p465_p4)
}
  0x2b   :  { %s469_s22 = scalar_lea.vmem %s51_s26, 16  ;;  %s473_s23 = scalar_lea.vmem %s51_s26, 32 }
  0x2c   :  { %p470_p5 = scmp.ne.s32.totalorder %s51_s26, %s469_s22  ;;  %p474_p6 = scmp.lt.s32.totalorder %s51_s26, %s51_s26 }
  0x2d   :  { %p475_p7 = scmp.lt.s32.totalorder %s473_s23, %s469_s22 }
  0x2f   :  { %p476_p8 = por %p475_p7, %p474_p6 }
  0x31   :  { %p477_p9 = pnand %p476_p8, %p470_p5 }
  0x33   :  { %480 = shalt.err (!%p477_p9)
}
  0x34   :  { %53 = dma.hbm_to_vmem [thread:$0]  %s681_s4, 16, %s51_s26, [#allocation6]  }
  0x35   :  { %s538_s25 = smov [#allocation8]   ;;  %s481_s30 = scalar_lea.hbm %s683_s6, 16 }
  0x36   :  { %s62_s27 = sshll.u32 %s538_s25, 4  ;;  %p482_p10 = scmp.ne.s32.totalorder %s683_s6, %s481_s30  ;;  %s63_s27 = int_to_ptr.vmem [resolvable:$true] %s62_s27 }
  0x37   :  { %p485_p11 = scmp.lt.u32.totalorder %s481_s30, %s683_s6 }
  0x39   :  { %p487_p12 = pnand %p485_p11, %p482_p10 }
  0x3b   :  { %490 = shalt.err (!%p487_p12)
}
  0x3c   :  { %s491_s10 = scalar_lea.vmem %s63_s27, 16  ;;  %s495_s4 = scalar_lea.vmem %s63_s27, 32 }
  0x3d   :  { %p492_p13 = scmp.ne.s32.totalorder %s63_s27, %s491_s10  ;;  %p496_p0 = scmp.lt.s32.totalorder %s63_s27, %s63_s27 }
  0x3e   :  { %p497_p1 = scmp.lt.s32.totalorder %s495_s4, %s491_s10 }
  0x40   :  { %p498_p2 = por %p497_p1, %p496_p0 }
  0x42   :  { %p499_p3 = pnand %p498_p2, %p492_p13 }
  0x44   :  { %502 = shalt.err (!%p499_p3)
}
  0x45   :  { %65 = dma.hbm_to_vmem [thread:$0]  %s683_s6, 16, %s63_s27, [#allocation9]  }
  0x46   :  { %525 = dma.done.wait [#allocation3], 128  }
  0x47   :  { %526 = vsyncadd [#allocation3], 4294967168 }
  0x48   :  { %527 = dma.done.wait [#allocation6], 144  }
  0x49   :  { %528 = vsyncadd [#allocation6], 4294967152 }
  0x4a   :  { %529 = dma.done.wait [#allocation9], 16  }
  0x4b   :  { %530 = vsyncadd [#allocation9], 4294967280  ;;  %v539_v0 = vmov 0.0   ;;  %vm540_vm0 = vmmov 0   ;;  %vm94_vm1 = vcmask 1041408   ;;  %v410_v3 = vld [vmem:[#allocation5] sm:$0xff]  }
  0x4c   :  { %373 = vmatprep.subr.bf16.mxu0 %v539_v0  ;;  %379 = vmatprep.subr.bf16.mxu1 %v539_v0  ;;  %v89_v1 = vld [vmem:[%s680_s3] sm:$0x3]  ;;  %vm90_vm2 = vcmask 31744   ;;  %vm144_vm3 = vcmask 130048   ;;  %v412_v9 = vld [vmem:[%s682_s5 + $0x8] sm:$0xff]   ;;  %vm221_vm4 = vcmask 261120  }
  0x4d   :  { %375 = vmatprep.mubr.msk.bf16.mxu0 %vm540_vm0, %v539_v0  ;;  %381 = vmatprep.mubr.msk.bf16.mxu1 %vm540_vm0, %v539_v0  ;;  %v96_v2 = vsel %vm94_vm1, %v89_v1, 0  ;;  %v87_v4 = vld [vmem:[%s678_s1] sm:$0xff]  ;;  %v354_v14 = vld [vmem:[#allocation7] ss:$0 sm:$0xff]  ;;  %v414_v24 = vld [vmem:[%s684_s7 + $0x8] sm:$0xff]   ;;  %s541_s24 = smov [#allocation10]  }
  0x4e   :  { %v83_v5 = vld [vmem:[#allocation2] sm:$0xff]  ;;  %374 = vmatpush3.bf16.msra.mxu0 %v96_v2  ;;  %v88_v6 = vpack.c.bf16 %v87_v4, %v87_v4  ;;  %380 = vmatpush3.bf16.msra.mxu1 %v410_v3  ;;  %v355_v25 = vld [vmem:[#allocation8] ss:$0 sm:$0xff]  ;;  %s340_s25 = sshll.u32 %s541_s24, 4  ;;  %s341_s25 = int_to_ptr.vmem [resolvable:$true] %s340_s25 }
  0x4f   :  { %v84_v7 = vpack.c.bf16 %v83_v5, %v83_v5  ;;  %385 = vmatprep.subr.bf16.mxu0 %v539_v0  ;;  %393 = vmatprep.subr.bf16.mxu1 %v539_v0  ;;  %v411_v8 = vld [vmem:[%s682_s5] sm:$0xff]   ;;  %p508_p5 = scmp.lt.s32.totalorder %s341_s25, %s341_s25 }
  0x50   :  { %v413_v10 = vld [vmem:[%s684_s7] sm:$0xff]   ;;  %s503_s7 = scalar_lea.vmem %s341_s25, 128 }
  0x51   :  { %376 = vmatmul.mubr.msk.bf16.vlgmr.msra.gmra.mrb[0].mxu0 %vm90_vm2, %v88_v6  ;;  %382 = vmatmul.mubr.msk.bf16.vlgmr.msra.gmra.mrb[0].mxu1 %vm144_vm3, %v84_v7  ;;  %v359_v33 = vld [vmem:[%s685_s8] ss:$0 sm:$0xff]  ;;  %p504_p4 = scmp.ne.s32.totalorder %s341_s25, %s503_s7  ;;  %p509_p6 = scmp.lt.s32.totalorder %s503_s7, %s503_s7 }
  0x52   :  { %389 = vmatprep.mubr.msk.bf16.mxu0 %vm540_vm0, %v539_v0  ;;  %397 = vmatprep.mubr.msk.bf16.mxu1 %vm540_vm0, %v539_v0 }
  0x53   :  { %386 = vmatpush3.bf16.msra.mxu0 %v411_v8  ;;  %394 = vmatpush3.bf16.msra.mxu1 %v413_v10  ;;  %p510_p7 = por %p509_p6, %p508_p5 }
  0x54   :  { %387 = vmatprep.subr.bf16.mxu0 %v539_v0  ;;  %395 = vmatprep.subr.bf16.mxu1 %v539_v0 }
  0x55   :  { %p511_p8 = pnand %p510_p7, %p504_p4 }
  0x57   :  { %388 = vmatpush3.bf16.msra.mxu0 %v412_v9  ;;  %396 = vmatpush3.bf16.msra.mxu1 %v414_v24 }
 0x124   :  { %v132_v11 = vpop.f32.mrb[0].mxu0  ;;  %v182_v13 = vpop.f32.mrb[0].mxu1 }
 0x125   :  { %v377_v12 = vpop.f32.mrb[1].mxu0  ;;  %v183_v15 = vadd.f32 %v182_v13, %v132_v11  ;;  %v383_v17 = vpop.f32.mrb[1].mxu1 }
 0x126   :  { %v135_v16 = vpop.f32.mrb[2].mxu0  ;;  %v185_v19 = vpop.f32.mrb[2].mxu1 }
 0x127   :  { %v378_v18 = vpop.f32.mrb[3].mxu0  ;;  %v195_v20 = vadd.f32 %v354_v14, %v183_v15  ;;  %v384_v21 = vpop.f32.mrb[3].mxu1 }
 0x129   :  { %v196_v22 = vmax.f32 %v195_v20, 0.0 }
 0x12b   :  { %v197_v23 = vpack.c.bf16 %v196_v22, %v196_v22 }
 0x12d   :  { %390 = vmatmul.mubr.msk.bf16.vlgmr.msra.gmra.mrb[4].mxu0 %vm221_vm4, %v197_v23 }
 0x200   :  { %v259_v26 = vpop.f32.mrb[4].mxu0 }
 0x201   :  { %v260_v27 = vadd.f32 %v355_v25, %v259_v26  ;;  %v391_v28 = vpop.f32.mrb[5].mxu0 }
 0x202   :  { %v262_v29 = vpop.f32.mrb[6].mxu0 }
 0x203   :  { %v265_v30 = vmax.f32 %v260_v27, 0.0  ;;  %v392_v31 = vpop.f32.mrb[7].mxu0 }
 0x205   :  { %v266_v32 = vpack.c.bf16 %v265_v30, %v265_v30 }
 0x207   :  { %398 = vmatmul.mubr.msk.bf16.vlgmr.msra.gmra.mrb[4].mxu1 %vm221_vm4, %v266_v32 }
 0x2da   :  { %v327_v34 = vpop.f32.mrb[4].mxu1 }
 0x2db   :  { %v328_v35 = vadd.f32 %v359_v33, %v327_v34  ;;  %v399_v36 = vpop.f32.mrb[5].mxu1 }
 0x2dc   :  { %v330_v37 = vpop.f32.mrb[6].mxu1 }
 0x2dd   :  { %333 = vst [vmem:[#allocation10] sm:$0xff] %v328_v35  ;;  %v400_v38 = vpop.f32.mrb[7].mxu1 }
 0x2de   :  { %514 = shalt.err (!%p511_p8)
}
 0x2df   :  { %s515_s8 = scalar_lea.hbm %s686_s9, 128 }
 0x2e0   :  { %p516_p9 = scmp.ne.s32.totalorder %s686_s9, %s515_s8  ;;  %p519_p10 = scmp.lt.u32.totalorder %s515_s8, %s686_s9 }
 0x2e2   :  { %p521_p11 = pnand %p519_p10, %p516_p9 }
 0x2e4   :  { %524 = shalt.err (!%p521_p11)
}
 0x2e5   :  { %343 = dma.vmem_to_hbm [thread:$0]  %s341_s25, 128, %s686_s9, [#allocation4]  }
 0x2e6   :  { %531 = dma.done.wait [#allocation4], 128  }
 0x2e7   :  { %532 = vsyncadd [#allocation4], 4294967168 }
 0x2e8   :  { %347 = vsyncpa [#allocation3], 1 }
 0x2e9   :  { %348 = vsyncpa [#allocation6], 1 }
 0x2ea   :  { %349 = vsyncpa [#allocation9], 1 }
 0x2eb   :  { %350 = vsyncpa [#allocation4], 1 }

</bundles_post_ra>
